<compile_context>
chip_gen: v5e
topology: v5e:2x2
jax: 0.10.0
libtpu: 0.0.40
codegen_flags: <defaults>
</compile_context>

<pallas_src>
import jax
import jax.numpy as jnp
from jax import lax
from jax.experimental import pallas as pl
from jax.experimental.pallas import tpu as pltpu


def _ds_conv_kernel(x_ref, xh_ref, w_ref, b_ref, o_ref, acc_ref):
    """One (batch n, Cout-tile j, row-tile r) step of the stride-2 3x3 conv.

    x_ref  : (1, TR, OWp, KC)   bf16  space-to-depth rows of this tile
    xh_ref : (1, 1,  OWp, KC)   bf16  halo row (s2d row r*TR + TR)
    w_ref  : (2, 2, KC, CT)     bf16  2x2-phase weights (Cout tile j)
    b_ref  : (1, CT)            f32   bias (Cout tile j)
    o_ref  : (1, TR, OWp, CT)   bf16  output tile
    acc_ref: (TR*OWp, CT)       f32   VMEM accumulator scratch
    """
    _, tr, owp, kc = x_ref.shape
    ct = o_ref.shape[3]
    m = tr * owp
    f32 = jnp.float32

    # Flatten the tile: OWp is a multiple of 16 so this is a pure relabel (no copy).
    s = x_ref[0].reshape(m, kc)
    # dw=+1 shifted slab (one materialization per step).  Column c reads column c+1;
    # the wrapped last column only ever feeds junk output columns (OWp >= OW+1).
    s_sh = jnp.concatenate(
        [x_ref[0, :, 1:, :], x_ref[0, :, :1, :]], axis=1).reshape(m, kc)

    h = xh_ref[0, 0]                                              # (owp, kc)
    h_sh = jnp.concatenate([xh_ref[0, 0, 1:, :], xh_ref[0, 0, :1, :]], axis=0)

    # Initialize the f32 VMEM accumulator with the bias, then accumulate MXU GEMMs.
    acc_ref[...] = jnp.broadcast_to(b_ref[...], (m, ct))

    # dh = 0 taps (all output rows of the tile).
    acc_ref[...] += jnp.dot(s, w_ref[0, 0], preferred_element_type=f32)
    acc_ref[...] += jnp.dot(s_sh, w_ref[0, 1], preferred_element_type=f32)

    # dh = 1 taps.  Rows 0..TR-2 read the next in-block row; the tile's last output
    # row reads the separately-fetched halo row.
    mi = m - owp
    if tr > 1:
        acc_ref[0:mi, :] += jnp.dot(s[owp:], w_ref[1, 0], preferred_element_type=f32)
        acc_ref[0:mi, :] += jnp.dot(s_sh[owp:], w_ref[1, 1], preferred_element_type=f32)
    acc_ref[mi:m, :] += jnp.dot(h, w_ref[1, 0], preferred_element_type=f32)
    acc_ref[mi:m, :] += jnp.dot(h_sh, w_ref[1, 1], preferred_element_type=f32)

    # Single bf16 store (lane-dense: CT is a multiple of 128).
    o_ref[0] = acc_ref[...].astype(o_ref.dtype).reshape(tr, owp, ct)


def downsample_pallas(x_nchw, weight, bias, *, target_pixels_per_tile=1024):
    """Conv2d(dim_in, dim_out, 3, stride=2, padding=1) forward.

    x_nchw : (N, Cin, H, W), weight : (Cout, Cin, 3, 3) torch layout, bias : (Cout,).
    Returns (N, Cout, OH, OW) in x's dtype.
    """
    N, Cin, H, W = x_nchw.shape
    Cout = weight.shape[0]
    OH = (H - 1) // 2 + 1
    OW = (W - 1) // 2 + 1

    LANE, SUB = 128, 16                    # lane width / bf16 sublane packing
    KC = 4 * Cin                           # space-to-depth channel dim
    Cout_pad = pl.cdiv(Cout, LANE) * LANE
    # Tile width including >=1 halo/junk column, 16-aligned so in-kernel flattens are free.
    OWp = pl.cdiv(OW + 1, SUB) * SUB

    # ---- Cout tiling: bound resident weight VMEM (matters on v7x's 64 MiB) ----
    w_budget = 12 * 1024 * 1024
    CT = Cout_pad
    for d in range(1, Cout_pad // LANE + 1):
        if Cout_pad % d:
            continue
        ct = Cout_pad // d
        if ct % LANE:
            continue
        CT = ct
        if 2 * (4 * KC * CT * 2) <= w_budget:      # double-buffered bf16 weights
            break
    NCO = Cout_pad // CT

    # ---- Row tiling: target useful pixels / tile; shrink if the working set is too big.
    TR = max(1, min(OH, max(1, target_pixels_per_tile // max(OW, 1))))

    def vmem_bytes(tr):
        m = tr * OWp
        return (2 * m * KC * 2 + 2 * OWp * KC * 2        # x main + halo (x2 buffers, bf16)
                + 2 * m * CT * 2 + m * CT * 4            # out (x2 buffers, bf16) + f32 acc
                + 2 * (4 * KC * CT * 2) + 2 * CT * 4)    # weights + bias

    while TR > 1 and vmem_bytes(TR) > 40 * 1024 * 1024:
        TR = pl.cdiv(TR, 2)
    NT = pl.cdiv(OH, TR)

    # Give the (v7x) megacore / DMA pipeline enough grid steps for small N / spatial.
    min_steps = 8
    if N * NCO * NT < min_steps and NT < OH:
        NT = min(OH, pl.cdiv(min_steps, max(N * NCO, 1)))
        TR = pl.cdiv(OH, NT)
        NT = pl.cdiv(OH, TR)
    OHt = NT * TR

    # ---- Glue: NCHW -> NHWC bf16, pad, space-to-depth (2x2 pixel phases -> channels).
    # No halo duplication is materialized in HBM; halo rows are fetched by a 2nd BlockSpec.
    HS, WS = OHt + 1, OWp
    HP, WP = 2 * HS, 2 * WS
    xh = jnp.transpose(x_nchw, (0, 2, 3, 1)).astype(jnp.bfloat16)
    xp = jnp.pad(xh, ((0, 0), (1, HP - 1 - H), (1, WP - 1 - W), (0, 0)))
    xs = xp.reshape(N, HS, 2, WS, 2, Cin)
    xs = jnp.transpose(xs, (0, 1, 3, 2, 4, 5)).reshape(N, HS, WS, KC)

    # torch weight (Cout, Cin, 3, 3) -> space-to-depth weight (2, 2, 4*Cin, Cout_pad)
    # (zeros where the 3x3 taps are absent in a 4x4 phase grid).
    wf = weight.astype(jnp.float32)
    w2 = jnp.zeros((2, 2, 2, 2, Cin, Cout), jnp.float32)
    for kh in range(3):
        for kw in range(3):
            w2 = w2.at[kh // 2, kw // 2, kh % 2, kw % 2].set(wf[:, :, kh, kw].T)
    w2 = w2.reshape(2, 2, KC, Cout)
    w2 = jnp.pad(w2, ((0, 0), (0, 0), (0, 0), (0, Cout_pad - Cout))).astype(jnp.bfloat16)
    b2 = jnp.pad(bias.astype(jnp.float32), (0, Cout_pad - Cout)).reshape(1, Cout_pad)

    # ---- Cost / VMEM hints (honest: counts the padded work actually executed). ----
    flops = 2 * N * OHt * OWp * (4 * KC) * Cout_pad
    w_fetches = 1 if NCO == 1 else N * NCO
    bytes_accessed = (NCO * N * HS * WS * KC * 2            # main input blocks
                      + N * NT * OWp * KC * 2               # halo rows
                      + w_fetches * 4 * KC * Cout_pad * 2   # weights
                      + N * OHt * OWp * Cout_pad * 2        # bf16 output writeback
                      + Cout_pad * 4)
    vmem_limit = min(64 * 1024 * 1024,
                     max(32 * 1024 * 1024, int(vmem_bytes(TR) * 1.5)))

    grid = (N, NCO, NT)
    out = pl.pallas_call(
        _ds_conv_kernel,
        out_shape=jax.ShapeDtypeStruct((N, OHt, OWp, Cout_pad), jnp.bfloat16),
        grid_spec=pltpu.PrefetchScalarGridSpec(
            num_scalar_prefetch=0,
            grid=grid,
            in_specs=[
                # main rows of the tile
                pl.BlockSpec((1, TR, OWp, KC), lambda n, j, r: (n, r, 0, 0)),
                # 1-row halo: block size 1 along rows => block index is the element row
                pl.BlockSpec((1, 1, OWp, KC), lambda n, j, r: (n, r * TR + TR, 0, 0)),
                # resident (per Cout tile) weights / bias
                pl.BlockSpec((2, 2, KC, CT), lambda n, j, r: (0, 0, 0, j)),
                pl.BlockSpec((1, CT), lambda n, j, r: (0, j)),
            ],
            out_specs=pl.BlockSpec((1, TR, OWp, CT), lambda n, j, r: (n, r, 0, j)),
            scratch_shapes=[pltpu.VMEM((TR * OWp, CT), jnp.float32)],
        ),
        compiler_params=pltpu.CompilerParams(
            dimension_semantics=("parallel", "parallel", "parallel"),
            vmem_limit_bytes=vmem_limit,
        ),
        cost_estimate=pl.CostEstimate(flops=flops, transcendentals=0,
                                      bytes_accessed=bytes_accessed),
    )(xs, xs, w2, b2)

    out = out[:, :OH, :OW, :Cout]
    return jnp.transpose(out, (0, 3, 1, 2)).astype(x_nchw.dtype)


def _check(x, weight, bias):
    N, Cin, H, W = x.shape
    Cout = weight.shape[0]
    OH = (H - 1) // 2 + 1
    OW = (W - 1) // 2 + 1

    out = jax.block_until_ready(jax.jit(downsample_pallas)(x, weight, bias))
    assert out.shape == (N, Cout, OH, OW), out.shape

    # Reference 1: exact conv semantics with bf16-rounded operands (what the MXU sees);
    # tolerance covers the bf16 output store.
    xq = x.astype(jnp.bfloat16).astype(jnp.float32)
    wq = weight.astype(jnp.bfloat16).astype(jnp.float32)
    ref_q = lax.conv_general_dilated(
        xq, wq, window_strides=(2, 2), padding=((1, 1), (1, 1)),
        dimension_numbers=("NCHW", "OIHW", "NCHW")) + bias.reshape(1, Cout, 1, 1)
    assert jnp.allclose(out, ref_q, atol=2e-2, rtol=2e-2), \
        float(jnp.max(jnp.abs(out - ref_q)))

    # Reference 2: full-f32 conv (looser bound: bf16 operand + output rounding).
    ref = lax.conv_general_dilated(
        x, weight, window_strides=(2, 2), padding=((1, 1), (1, 1)),
        dimension_numbers=("NCHW", "OIHW", "NCHW")) + bias.reshape(1, Cout, 1, 1)
    assert jnp.allclose(out, ref, atol=8e-2, rtol=8e-2), \
        float(jnp.max(jnp.abs(out - ref)))


if __name__ == "__main__":
    key = jax.random.PRNGKey(0)

    # Main case (matches the module's intended use at small scale).
    k1, k2, k3, k4, k5, k6 = jax.random.split(key, 6)
    N, Cin, H, W, Cout = 2, 4, 16, 16, 8
    x = jax.random.normal(k1, (N, Cin, H, W), dtype=jnp.float32)
    weight = jax.random.normal(k2, (Cout, Cin, 3, 3), dtype=jnp.float32) * 0.1
    bias = jax.random.normal(k3, (Cout,), dtype=jnp.float32) * 0.1
    _check(x, weight, bias)

    # Odd spatial size / single batch: exercises padding, TR==1 path, halo rows.
    N2, Cin2, H2, W2, Cout2 = 1, 3, 9, 9, 5
    x2 = jax.random.normal(k4, (N2, Cin2, H2, W2), dtype=jnp.float32)
    weight2 = jax.random.normal(k5, (Cout2, Cin2, 3, 3), dtype=jnp.float32) * 0.1
    bias2 = jax.random.normal(k6, (Cout2,), dtype=jnp.float32) * 0.1
    _check(x2, weight2, bias2)

    print("KERNEL_OK")
</pallas_src>

<mosaic_0001>
module attributes {stable_mosaic.version = 11 : i64} {
  func.func @_ds_conv_kernel(%arg0: i32, %arg1: i32, %arg2: i32, %arg3: memref<1x2x16x16xbf16, #tpu.memory_space<vmem>>, %arg4: memref<1x1x16x16xbf16, #tpu.memory_space<vmem>>, %arg5: memref<2x2x16x128xbf16, #tpu.memory_space<vmem>>, %arg6: memref<1x128xf32, #tpu.memory_space<vmem>>, %arg7: memref<1x2x16x128xbf16, #tpu.memory_space<vmem>>, %arg8: memref<32x128xf32, #tpu.memory_space<vmem>>) attributes {dimension_semantics = [#tpu.dimension_semantics<parallel>, #tpu.dimension_semantics<parallel>, #tpu.dimension_semantics<parallel>], iteration_bounds = array<i64: 2, 1, 4>, scalar_prefetch = 0 : i64, scratch_operands = 1 : i64, tpu.core_type = #tpu.core_type<tc>, window_params = [{transform_indices = @transform_0, window_bounds = array<i64: 1, 2, 16, 16>}, {transform_indices = @transform_1, window_bounds = array<i64: 1, 1, 16, 16>}, {transform_indices = @transform_2, window_bounds = array<i64: 2, 2, 16, 128>}, {transform_indices = @transform_3, window_bounds = array<i64: 1, 128>}, {transform_indices = @transform_4, window_bounds = array<i64: 1, 2, 16, 128>}]} {
    %c0 = arith.constant 0 : index
    %c0_0 = arith.constant 0 : index
    %c0_1 = arith.constant 0 : index
    %c0_2 = arith.constant 0 : index
    %0 = vector.load %arg3[%c0, %c0_0, %c0_1, %c0_2] : memref<1x2x16x16xbf16, #tpu.memory_space<vmem>>, vector<1x2x16x16xbf16>
    %1 = vector.shape_cast %0 : vector<1x2x16x16xbf16> to vector<2x16x16xbf16>
    %2 = vector.shape_cast %1 : vector<2x16x16xbf16> to vector<32x16xbf16>
    %c0_3 = arith.constant 0 : index
    %c0_4 = arith.constant 0 : index
    %c1 = arith.constant 1 : index
    %c0_5 = arith.constant 0 : index
    %3 = vector.load %arg3[%c0_3, %c0_4, %c1, %c0_5] : memref<1x2x16x16xbf16, #tpu.memory_space<vmem>>, vector<1x2x15x16xbf16>
    %4 = vector.shape_cast %3 : vector<1x2x15x16xbf16> to vector<2x15x16xbf16>
    %c0_6 = arith.constant 0 : index
    %c0_7 = arith.constant 0 : index
    %c0_8 = arith.constant 0 : index
    %c0_9 = arith.constant 0 : index
    %5 = vector.load %arg3[%c0_6, %c0_7, %c0_8, %c0_9] : memref<1x2x16x16xbf16, #tpu.memory_space<vmem>>, vector<1x2x1x16xbf16>
    %6 = vector.shape_cast %5 : vector<1x2x1x16xbf16> to vector<2x1x16xbf16>
    %7 = tpu.concatenate %4, %6 in 1 : vector<2x15x16xbf16>, vector<2x1x16xbf16> -> vector<2x16x16xbf16>
    %8 = vector.shape_cast %7 : vector<2x16x16xbf16> to vector<32x16xbf16>
    %c0_10 = arith.constant 0 : index
    %c0_11 = arith.constant 0 : index
    %c0_12 = arith.constant 0 : index
    %c0_13 = arith.constant 0 : index
    %9 = vector.load %arg4[%c0_10, %c0_11, %c0_12, %c0_13] : memref<1x1x16x16xbf16, #tpu.memory_space<vmem>>, vector<1x1x16x16xbf16>
    %10 = vector.shape_cast %9 : vector<1x1x16x16xbf16> to vector<16x16xbf16>
    %c0_14 = arith.constant 0 : index
    %c0_15 = arith.constant 0 : index
    %c1_16 = arith.constant 1 : index
    %c0_17 = arith.constant 0 : index
    %11 = vector.load %arg4[%c0_14, %c0_15, %c1_16, %c0_17] : memref<1x1x16x16xbf16, #tpu.memory_space<vmem>>, vector<1x1x15x16xbf16>
    %12 = vector.shape_cast %11 : vector<1x1x15x16xbf16> to vector<15x16xbf16>
    %c0_18 = arith.constant 0 : index
    %c0_19 = arith.constant 0 : index
    %c0_20 = arith.constant 0 : index
    %c0_21 = arith.constant 0 : index
    %13 = vector.load %arg4[%c0_18, %c0_19, %c0_20, %c0_21] : memref<1x1x16x16xbf16, #tpu.memory_space<vmem>>, vector<1x1x1x16xbf16>
    %14 = vector.shape_cast %13 : vector<1x1x1x16xbf16> to vector<1x16xbf16>
    %15 = tpu.concatenate %12, %14 in 0 : vector<15x16xbf16>, vector<1x16xbf16> -> vector<16x16xbf16>
    %c0_22 = arith.constant 0 : index
    %c0_23 = arith.constant 0 : index
    %16 = vector.load %arg6[%c0_22, %c0_23] : memref<1x128xf32, #tpu.memory_space<vmem>>, vector<1x128xf32>
    %17 = vector.shape_cast %16 : vector<1x128xf32> to vector<1x128xf32>
    %18 = vector.broadcast %17 : vector<1x128xf32> to vector<32x128xf32>
    %c0_24 = arith.constant 0 : index
    %c0_25 = arith.constant 0 : index
    %19 = vector.load %arg8[%c0_24, %c0_25] : memref<32x128xf32, #tpu.memory_space<vmem>>, vector<32x128xf32>
    tpu.vector_store %arg8[%c0_24, %c0_25], %18 {strides = array<i32>} : memref<32x128xf32, #tpu.memory_space<vmem>>, vector<32x128xf32>,
    %c0_26 = arith.constant 0 : index
    %c0_27 = arith.constant 0 : index
    %20 = vector.load %arg8[%c0_26, %c0_27] : memref<32x128xf32, #tpu.memory_space<vmem>>, vector<32x128xf32>
    %c0_28 = arith.constant 0 : index
    %c0_29 = arith.constant 0 : index
    %c0_30 = arith.constant 0 : index
    %c0_31 = arith.constant 0 : index
    %21 = vector.load %arg5[%c0_28, %c0_29, %c0_30, %c0_31] : memref<2x2x16x128xbf16, #tpu.memory_space<vmem>>, vector<1x1x16x128xbf16>
    %22 = vector.shape_cast %21 : vector<1x1x16x128xbf16> to vector<16x128xbf16>
    %cst = arith.constant dense<0.000000e+00> : vector<32x128xf32>
    %23 = tpu.matmul %2, %22, %cst {dimension_numbers = #tpu.dot_dimension_numbers<[1], [0], [0], [1], [0, 0, 1, 1], [], []>} : vector<32x16xbf16>, vector<16x128xbf16>, vector<32x128xf32> -> vector<32x128xf32>
    %24 = arith.addf %20, %23 : vector<32x128xf32>
    %c0_32 = arith.constant 0 : index
    %c0_33 = arith.constant 0 : index
    %25 = vector.load %arg8[%c0_32, %c0_33] : memref<32x128xf32, #tpu.memory_space<vmem>>, vector<32x128xf32>
    tpu.vector_store %arg8[%c0_32, %c0_33], %24 {strides = array<i32>} : memref<32x128xf32, #tpu.memory_space<vmem>>, vector<32x128xf32>,
    %c0_34 = arith.constant 0 : index
    %c0_35 = arith.constant 0 : index
    %26 = vector.load %arg8[%c0_34, %c0_35] : memref<32x128xf32, #tpu.memory_space<vmem>>, vector<32x128xf32>
    %c0_36 = arith.constant 0 : index
    %c1_37 = arith.constant 1 : index
    %c0_38 = arith.constant 0 : index
    %c0_39 = arith.constant 0 : index
    %27 = vector.load %arg5[%c0_36, %c1_37, %c0_38, %c0_39] : memref<2x2x16x128xbf16, #tpu.memory_space<vmem>>, vector<1x1x16x128xbf16>
    %28 = vector.shape_cast %27 : vector<1x1x16x128xbf16> to vector<16x128xbf16>
    %cst_40 = arith.constant dense<0.000000e+00> : vector<32x128xf32>
    %29 = tpu.matmul %8, %28, %cst_40 {dimension_numbers = #tpu.dot_dimension_numbers<[1], [0], [0], [1], [0, 0, 1, 1], [], []>} : vector<32x16xbf16>, vector<16x128xbf16>, vector<32x128xf32> -> vector<32x128xf32>
    %30 = arith.addf %26, %29 : vector<32x128xf32>
    %c0_41 = arith.constant 0 : index
    %c0_42 = arith.constant 0 : index
    %31 = vector.load %arg8[%c0_41, %c0_42] : memref<32x128xf32, #tpu.memory_space<vmem>>, vector<32x128xf32>
    tpu.vector_store %arg8[%c0_41, %c0_42], %30 {strides = array<i32>} : memref<32x128xf32, #tpu.memory_space<vmem>>, vector<32x128xf32>,
    %c0_43 = arith.constant 0 : index
    %c0_44 = arith.constant 0 : index
    %32 = vector.load %arg8[%c0_43, %c0_44] : memref<32x128xf32, #tpu.memory_space<vmem>>, vector<16x128xf32>
    %33 = vector.extract_strided_slice %2 {offsets = [16, 0], sizes = [16, 16], strides = [1, 1]} : vector<32x16xbf16> to vector<16x16xbf16>
    %c1_45 = arith.constant 1 : index
    %c0_46 = arith.constant 0 : index
    %c0_47 = arith.constant 0 : index
    %c0_48 = arith.constant 0 : index
    %34 = vector.load %arg5[%c1_45, %c0_46, %c0_47, %c0_48] : memref<2x2x16x128xbf16, #tpu.memory_space<vmem>>, vector<1x1x16x128xbf16>
    %35 = vector.shape_cast %34 : vector<1x1x16x128xbf16> to vector<16x128xbf16>
    %cst_49 = arith.constant dense<0.000000e+00> : vector<16x128xf32>
    %36 = tpu.matmul %33, %35, %cst_49 {dimension_numbers = #tpu.dot_dimension_numbers<[1], [0], [0], [1], [0, 0, 1, 1], [], []>} : vector<16x16xbf16>, vector<16x128xbf16>, vector<16x128xf32> -> vector<16x128xf32>
    %37 = arith.addf %32, %36 : vector<16x128xf32>
    %c0_50 = arith.constant 0 : index
    %c0_51 = arith.constant 0 : index
    %38 = vector.load %arg8[%c0_50, %c0_51] : memref<32x128xf32, #tpu.memory_space<vmem>>, vector<16x128xf32>
    tpu.vector_store %arg8[%c0_50, %c0_51], %37 {strides = array<i32>} : memref<32x128xf32, #tpu.memory_space<vmem>>, vector<16x128xf32>,
    %c0_52 = arith.constant 0 : index
    %c0_53 = arith.constant 0 : index
    %39 = vector.load %arg8[%c0_52, %c0_53] : memref<32x128xf32, #tpu.memory_space<vmem>>, vector<16x128xf32>
    %40 = vector.extract_strided_slice %8 {offsets = [16, 0], sizes = [16, 16], strides = [1, 1]} : vector<32x16xbf16> to vector<16x16xbf16>
    %c1_54 = arith.constant 1 : index
    %c1_55 = arith.constant 1 : index
    %c0_56 = arith.constant 0 : index
    %c0_57 = arith.constant 0 : index
    %41 = vector.load %arg5[%c1_54, %c1_55, %c0_56, %c0_57] : memref<2x2x16x128xbf16, #tpu.memory_space<vmem>>, vector<1x1x16x128xbf16>
    %42 = vector.shape_cast %41 : vector<1x1x16x128xbf16> to vector<16x128xbf16>
    %cst_58 = arith.constant dense<0.000000e+00> : vector<16x128xf32>
    %43 = tpu.matmul %40, %42, %cst_58 {dimension_numbers = #tpu.dot_dimension_numbers<[1], [0], [0], [1], [0, 0, 1, 1], [], []>} : vector<16x16xbf16>, vector<16x128xbf16>, vector<16x128xf32> -> vector<16x128xf32>
    %44 = arith.addf %39, %43 : vector<16x128xf32>
    %c0_59 = arith.constant 0 : index
    %c0_60 = arith.constant 0 : index
    %45 = vector.load %arg8[%c0_59, %c0_60] : memref<32x128xf32, #tpu.memory_space<vmem>>, vector<16x128xf32>
    tpu.vector_store %arg8[%c0_59, %c0_60], %44 {strides = array<i32>} : memref<32x128xf32, #tpu.memory_space<vmem>>, vector<16x128xf32>,
    %c16 = arith.constant 16 : index
    %c0_61 = arith.constant 0 : index
    %46 = vector.load %arg8[%c16, %c0_61] : memref<32x128xf32, #tpu.memory_space<vmem>>, vector<16x128xf32>
    %c1_62 = arith.constant 1 : index
    %c0_63 = arith.constant 0 : index
    %c0_64 = arith.constant 0 : index
    %c0_65 = arith.constant 0 : index
    %47 = vector.load %arg5[%c1_62, %c0_63, %c0_64, %c0_65] : memref<2x2x16x128xbf16, #tpu.memory_space<vmem>>, vector<1x1x16x128xbf16>
    %48 = vector.shape_cast %47 : vector<1x1x16x128xbf16> to vector<16x128xbf16>
    %cst_66 = arith.constant dense<0.000000e+00> : vector<16x128xf32>
    %49 = tpu.matmul %10, %48, %cst_66 {dimension_numbers = #tpu.dot_dimension_numbers<[1], [0], [0], [1], [0, 0, 1, 1], [], []>} : vector<16x16xbf16>, vector<16x128xbf16>, vector<16x128xf32> -> vector<16x128xf32>
    %50 = arith.addf %46, %49 : vector<16x128xf32>
    %c16_67 = arith.constant 16 : index
    %c0_68 = arith.constant 0 : index
    %51 = vector.load %arg8[%c16_67, %c0_68] : memref<32x128xf32, #tpu.memory_space<vmem>>, vector<16x128xf32>
    tpu.vector_store %arg8[%c16_67, %c0_68], %50 {strides = array<i32>} : memref<32x128xf32, #tpu.memory_space<vmem>>, vector<16x128xf32>,
    %c16_69 = arith.constant 16 : index
    %c0_70 = arith.constant 0 : index
    %52 = vector.load %arg8[%c16_69, %c0_70] : memref<32x128xf32, #tpu.memory_space<vmem>>, vector<16x128xf32>
    %c1_71 = arith.constant 1 : index
    %c1_72 = arith.constant 1 : index
    %c0_73 = arith.constant 0 : index
    %c0_74 = arith.constant 0 : index
    %53 = vector.load %arg5[%c1_71, %c1_72, %c0_73, %c0_74] : memref<2x2x16x128xbf16, #tpu.memory_space<vmem>>, vector<1x1x16x128xbf16>
    %54 = vector.shape_cast %53 : vector<1x1x16x128xbf16> to vector<16x128xbf16>
    %cst_75 = arith.constant dense<0.000000e+00> : vector<16x128xf32>
    %55 = tpu.matmul %15, %54, %cst_75 {dimension_numbers = #tpu.dot_dimension_numbers<[1], [0], [0], [1], [0, 0, 1, 1], [], []>} : vector<16x16xbf16>, vector<16x128xbf16>, vector<16x128xf32> -> vector<16x128xf32>
    %56 = arith.addf %52, %55 : vector<16x128xf32>
    %c16_76 = arith.constant 16 : index
    %c0_77 = arith.constant 0 : index
    %57 = vector.load %arg8[%c16_76, %c0_77] : memref<32x128xf32, #tpu.memory_space<vmem>>, vector<16x128xf32>
    tpu.vector_store %arg8[%c16_76, %c0_77], %56 {strides = array<i32>} : memref<32x128xf32, #tpu.memory_space<vmem>>, vector<16x128xf32>,
    %c0_78 = arith.constant 0 : index
    %c0_79 = arith.constant 0 : index
    %58 = vector.load %arg8[%c0_78, %c0_79] : memref<32x128xf32, #tpu.memory_space<vmem>>, vector<32x128xf32>
    %59 = arith.truncf %58 : vector<32x128xf32> to vector<32x128xbf16>
    %60 = vector.shape_cast %59 : vector<32x128xbf16> to vector<2x16x128xbf16>
    %c0_80 = arith.constant 0 : index
    %c0_81 = arith.constant 0 : index
    %c0_82 = arith.constant 0 : index
    %c0_83 = arith.constant 0 : index
    %61 = vector.load %arg7[%c0_80, %c0_81, %c0_82, %c0_83] : memref<1x2x16x128xbf16, #tpu.memory_space<vmem>>, vector<1x2x16x128xbf16>
    %62 = vector.shape_cast %61 : vector<1x2x16x128xbf16> to vector<2x16x128xbf16>
    %63 = vector.shape_cast %60 : vector<2x16x128xbf16> to vector<1x2x16x128xbf16>
    tpu.vector_store %arg7[%c0_80, %c0_81, %c0_82, %c0_83], %63 {strides = array<i32>} : memref<1x2x16x128xbf16, #tpu.memory_space<vmem>>, vector<1x2x16x128xbf16>,
    return
  }
  func.func @transform_0(%arg0: i32, %arg1: i32, %arg2: i32) -> (i32, i32, i32, i32) {
    %c0_i32 = arith.constant 0 : i32
    %c0_i32_0 = arith.constant 0 : i32
    %c0_i32_1 = arith.constant 0 : i32
    return %arg0, %arg2, %c0_i32, %c0_i32_0 : i32, i32, i32, i32
  }
  func.func @transform_1(%arg0: i32, %arg1: i32, %arg2: i32) -> (i32, i32, i32, i32) {
    %c2_i32 = arith.constant 2 : i32
    %0 = arith.muli %arg2, %c2_i32 : i32
    %c2_i32_0 = arith.constant 2 : i32
    %1 = arith.addi %0, %c2_i32_0 : i32
    %c0_i32 = arith.constant 0 : i32
    %c0_i32_1 = arith.constant 0 : i32
    %c0_i32_2 = arith.constant 0 : i32
    return %arg0, %1, %c0_i32, %c0_i32_1 : i32, i32, i32, i32
  }
  func.func @transform_2(%arg0: i32, %arg1: i32, %arg2: i32) -> (i32, i32, i32, i32) {
    %c0_i32 = arith.constant 0 : i32
    %c0_i32_0 = arith.constant 0 : i32
    %c0_i32_1 = arith.constant 0 : i32
    %c0_i32_2 = arith.constant 0 : i32
    return %c0_i32, %c0_i32_0, %c0_i32_1, %arg1 : i32, i32, i32, i32
  }
  func.func @transform_3(%arg0: i32, %arg1: i32, %arg2: i32) -> (i32, i32) {
    %c0_i32 = arith.constant 0 : i32
    %c0_i32_0 = arith.constant 0 : i32
    return %c0_i32, %arg1 : i32, i32
  }
  func.func @transform_4(%arg0: i32, %arg1: i32, %arg2: i32) -> (i32, i32, i32, i32) {
    %c0_i32 = arith.constant 0 : i32
    %c0_i32_0 = arith.constant 0 : i32
    return %arg0, %arg2, %c0_i32, %arg1 : i32, i32, i32, i32
  }
}

</mosaic_0001>

<bundles_post_ra>
// kernel: downsample_pallas.1
= control target key start
LH: loop header
LB: loop body
LE: loop exit
PB: predicated region body
PF: predicated region fallthrough
CT: control target
= control target key end

     0   :  { %s1031_s15 = smov 0   ;;  %s1033_s16 = smov 0   ;;  %s1136_s0 = inlined_call_operand.vmem [shape: bf16[2,9,16,16], index: 0, kind: input, shape index: {}, may-alias: {0,1}]   ;;  %s1137_s1 = inlined_call_operand.vmem [shape: bf16[2,9,16,16], index: 1, kind: input, shape index: {}, may-alias: {0,1}]   ;;  %s1138_s2 = inlined_call_operand.vmem [shape: bf16[2,2,16,128], index: 2, kind: input, shape index: {}]   ;;  %s1139_s3 = inlined_call_operand.vmem [shape: f32[1,128], index: 3, kind: input, shape index: {}]   ;;  %s1140_s4 = inlined_call_operand.vmem [shape: bf16[2,8,16,128], index: 4, kind: output, shape index: {}]  }
   0x1   :  { %s1035_s17 = smov 0   ;;  %s1037_s18 = smov 0  }
   0x2   :  { %s1039_s19 = smov 0  }
   0x3 LB: > { %s26_s20 = sadd.s32 1, %s996_s17  ;;  %s33_s21 = sadd.s32 1, %s1000_s18  ;;  %s1004_s19 = sphi %s1039_s19, %s14_s19   ;;  %s1000_s18 = sphi %s1037_s18, %s1146_s18   ;;  %s996_s17 = sphi %s1035_s17, %s1145_s17   ;;  %s992_s16 = sphi %s1033_s16, %s1144_s16   ;;  %s988_s15 = sphi %s1031_s15, %s1143_s15  }
   0x4   : > { %p27_p0 = scmp.ge.s32.totalorder %s26_s20, 4  ;;  %p837_p1 = scmp.ge.s32.totalorder %s1004_s19, 1 }
   0x5   : > { %p244_p2 = scmp.lt.s32.totalorder %s1004_s19, 9 }
   0x6   : > { %s1148_s20 = smov (%p27_p0, %s26_s20), 0  ;;  %s1150_s21 = smov (!%p27_p0, %s33_s21), %s1000_s18 }
   0x7   : > { %p245_p3 = pnand %p837_p1, %p244_p2  ;;  %p35_p4 = scmp.ge.s32.totalorder %s1150_s21, 2 }
   0x8   : > { %s1067_s26 = sshll.u32 (!%p245_p3), %s988_s15, 1  ;;  %p312_p5 = scmp.lt.s32.totalorder (!%p245_p3), %s992_s16, 1 }
   0x9   : > { %s1152_s21 = smov (%p35_p4, %s1150_s21), 0  ;;  %248 = sbr.rel (%p245_p3) target bundleno = 193 (0xc1), region = 36 }
   0xa   : > { %p314_p6 = scmp.lt.s32.totalorder (!%p245_p3), %s1067_s26, 8  ;;  %s328_s11 = sadd.s32 (!%p245_p3), 2, %s1067_s26 }
   0xb   : > { %p331_p7 = scmp.lt.s32.totalorder (!%p245_p3), %s328_s11, 8  ;;  %p350_p8 = scmp.lt.s32.totalorder (!%p245_p3), %s1067_s26, 7 }
   0xe   : > { %v907_v0 = vld [vmem:[%s1138_s2] sm:$0xff]  ;;  %v909_v1 = vld [vmem:[%s1138_s2 + $0x10] sm:$0xff]  ;;  %v908_v2 = vld [vmem:[%s1138_s2 + $0x8] sm:$0xff]  ;;  %s1154_s16 = smov (!%p312_p5, %s992_s16), 1  ;;  %vm460_vm0 = vcmask 130048   ;;  %s1156_s11 = smov (!%p331_p7, %s328_s11), 8 }
   0xf   : > { %v910_v3 = vld [vmem:[%s1138_s2 + $0x18] sm:$0xff]  ;;  %v911_v4 = vld [vmem:[%s1138_s2 + $0x10] sm:$0xff]  ;;  %472 = vmatpush.bf16.msra.mxu0 %v907_v0  ;;  %556 = vmatpush.bf16.msra.mxu2 %v909_v1  ;;  %s315_s9 = scalar_select %p314_p6, %s1067_s26, 8  ;;  %vm410_vm1 = vcmask 1047552   ;;  %vm411_vm2 = vsmask.f32 7424 }
  0x10   : > { %v912_v5 = vld [vmem:[%s1138_s2 + $0x18] sm:$0xff]  ;;  %518 = vmatpush.bf16.msra.mxu1 %v908_v2  ;;  %585 = vmatpush.bf16.msra.mxu3 %v910_v3  ;;  %s924_s10 = smul.u32 18, %s1154_s16  ;;  %s842_s24 = sshll.u32 %s1156_s11, 1  ;;  %vm1096_vm3 = vmand %vm410_vm1, %vm411_vm2  ;;  %v965_v43 = vld [vmem:[%s1139_s3] ss:$0 sm:$0xff] }
  0x11   : > { %s839_s12 = sshll.u32 %s315_s9, 1  ;;  %s846_s5 = sshll.u32 %s1154_s16, 4 }
  0x12   : > { %s318_s13 = sadd.s32 %s924_s10, %s839_s12  ;;  %s335_s25 = sadd.s32 %s924_s10, %s842_s24 }
  0x13   : > { %615 = vmatpush.bf16.msrb.mxu2 %v911_v4  ;;  %s840_s14 = sshll.u32 %s318_s13, 2  ;;  %s843_s27 = sshll.u32 %s335_s25, 2 }
  0x14   : > { %646 = vmatpush.bf16.msrb.mxu3 %v912_v5  ;;  %s320_s23 = scalar_lea.vmem %s1136_s0, %s840_s14  ;;  %s337_s30 = scalar_lea.vmem %s1137_s1, %s843_s27 }
  0x15   : > { %v904_v6 = vld [vmem:[%s320_s23] sm:$0xff]  ;;  %v905_v7 = vld [vmem:[%s320_s23 + $0x8] sm:$0xff]  ;;  %s1158_s26 = smov (!%p350_p8, %s1067_s26), 7 }
  0x16   : > { %v366_v8 = vld [vmem:[%s320_s23] sm:$0x1]  ;;  %v367_v10 = vld [vmem:[%s320_s23 + $0x8] sm:$0x1]  ;;  %v381_v11 = vshll.u32 %v904_v6, 16  ;;  %864 = vmatmul.msk.bf16.vlgmr.msra.gmra.mxu0 %vm460_vm0, %v904_v6  ;;  %880 = vmatmul.msk.bf16.vlgmr.msra.gmra.mxu2 %vm460_vm0, %v905_v7  ;;  %v379_v12 = vshrl.u32 %v904_v6, 16 }
  0x17   : > { %v396_v9 = vunpack.c.l.b16 %v366_v8  ;;  %v388_v13 = vshll.u32 %v905_v7, 16  ;;  %v386_v15 = vshrl.u32 %v905_v7, 16  ;;  %v397_v16 = vunpack.c.l.b16 %v367_v10  ;;  %v417_v23 = vld [vmem:[%s337_s30] sm:$0x1]  ;;  %s845_s6 = sshll.u32 %s1158_s26, 1 }
  0x18   : > { %v383_v17 = vrot.slane %v381_v11, 1  ;;  %v906_v29 = vld [vmem:[%s337_s30] sm:$0xff]  ;;  %v432_v30 = vunpack.c.l.b16 %v417_v23  ;;  %s357_s7 = sadd.s32 %s846_s5, %s845_s6 }
  0x19   : > { %v398_v14 = vpack.c.b16 %v396_v9, %v396_v9  ;;  %v390_v18 = vrot.slane %v388_v13, 1  ;;  %v399_v20 = vpack.c.b16 %v397_v16, %v397_v16  ;;  %v426_v32 = vshll.u32 %v906_v29, 16  ;;  %s847_s16 = sshll.u32 %s357_s7, 2 }
  0x1a   : > { %v384_v21 = vor.u32 %v383_v17, %v379_v12  ;;  %v433_v33 = vpack.c.b16 %v432_v30, %v432_v30  ;;  %v424_v34 = vshrl.u32 %v906_v29, 16  ;;  %s359_s11 = scalar_lea.vmem %s1140_s4, %s847_s16 }
  0x1b   : > { %v401_v19 = vshll.u32 %v398_v14, 16  ;;  %v391_v25 = vor.u32 %v390_v18, %v386_v15  ;;  %v405_v26 = vshll.u32 %v399_v20, 16  ;;  %v428_v35 = vrot.slane %v426_v32, 1 }
  0x1c   : > { %v435_v36 = vshll.u32 %v433_v33, 16 }
  0x1d   : > { %v403_v24 = vrot.slane %v401_v19, 1  ;;  %v407_v28 = vrot.slane %v405_v26, 1  ;;  %v429_v37 = vor.u32 %v428_v35, %v424_v34 }
  0x1e   : > { %v437_v38 = vrot.slane %v435_v36, 1 }
  0x1f   : > { %v413_v27 = vsel %vm1096_vm3, %v384_v21, %v403_v24  ;;  %v414_v31 = vsel %vm1096_vm3, %v391_v25, %v407_v28 }
  0x20   : > { %872 = vmatmul.msk.bf16.vlgmr.msra.gmra.mxu1 %vm460_vm0, %v413_v27  ;;  %887 = vmatmul.msk.bf16.vlgmr.msra.gmra.mxu3 %vm460_vm0, %v414_v31  ;;  %v439_v39 = vsel %vm1096_vm3, %v429_v37, %v437_v38 }
  0x26   : > { %865 = vmatmul.msk.bf16.gmra.mxu0 %vm460_vm0, %v905_v7  ;;  %894 = vmatmul.msk.bf16.vlgmr.msrb.gmra.mxu2 %vm460_vm0, %v906_v29 }
  0x30   : > { %873 = vmatmul.msk.bf16.gmra.mxu1 %vm460_vm0, %v414_v31  ;;  %901 = vmatmul.msk.bf16.vlgmr.msrb.gmra.mxu3 %vm460_vm0, %v439_v39 }
  0x93   : > { %v474_v40 = vpop.f32.mrf.mxu0 }
  0x94   : > { %v484_v45 = vadd.f32 %v965_v43, %v474_v40 }
  0x99   : > { %v558_v41 = vpop.f32.mrf.mxu2 }
  0x9b   : > { %v476_v44 = vpop.f32.mrf.mxu0 }
  0x9c   : > { %v485_v49 = vadd.f32 %v965_v43, %v476_v44 }
  0x9d   : > { %v520_v42 = vpop.f32.mrf.mxu1 }
  0x9e   : > { %v530_v48 = vadd.f32 %v520_v42, %v484_v45 }
  0xa0   : > { %v563_v53 = vadd.f32 %v558_v41, %v530_v48 }
  0xa1   : > { %v560_v50 = vpop.f32.mrf.mxu2 }
  0xa3   : > { %v587_v46 = vpop.f32.mrf.mxu3  ;;  %v479_v52 = vpop.f32.mrf.mxu0 }
  0xa4   : > { %v592_v57 = vadd.f32 %v587_v46, %v563_v53  ;;  %v486_v61 = vadd.f32 %v965_v43, %v479_v52 }
  0xa5   : > { %v522_v47 = vpop.f32.mrf.mxu1 }
  0xa6   : > { %v531_v51 = vadd.f32 %v522_v47, %v485_v49 }
  0xa8   : > { %v564_v54 = vadd.f32 %v560_v50, %v531_v51 }
  0xa9   : > { %v617_v60 = vpop.f32.mrf.mxu2 }
  0xab   : > { %v589_v55 = vpop.f32.mrf.mxu3  ;;  %v481_v62 = vpop.f32.mrf.mxu0 }
  0xac   : > { %v593_v58 = vadd.f32 %v589_v55, %v564_v54  ;;  %v487_v2 = vadd.f32 %v965_v43, %v481_v62 }
  0xad   : > { %v525_v56 = vpop.f32.mrf.mxu1 }
  0xae   : > { %v916_v59 = vpack.c.bf16 %v593_v58, %v592_v57  ;;  %v532_v1 = vadd.f32 %v525_v56, %v486_v61 }
  0xb0   : > { %917 = vst [vmem:[%s359_s11] sm:$0xff] %v916_v59   ;;  %v622_v4 = vadd.f32 %v617_v60, %v532_v1 }
  0xb1   : > { %v619_v5 = vpop.f32.mrf.mxu2 }
  0xb3   : > { %v648_v63 = vpop.f32.mrf.mxu3 }
  0xb4   : > { %v653_v8 = vadd.f32 %v648_v63, %v622_v4 }
  0xb5   : > { %v527_v0 = vpop.f32.mrf.mxu1 }
  0xb6   : > { %v533_v3 = vadd.f32 %v527_v0, %v487_v2 }
  0xb8   : > { %v623_v6 = vadd.f32 %v619_v5, %v533_v3 }
  0xbb   : > { %v650_v7 = vpop.f32.mrf.mxu3 }
  0xbc   : > { %v654_v9 = vadd.f32 %v650_v7, %v623_v6 }
  0xbe   : > { %v921_v10 = vpack.c.bf16 %v654_v9, %v653_v8 }
  0xc0   : > { %923 = vst [vmem:[%s359_s11 + $0x8] sm:$0xff] %v921_v10  }
  0xc1 PF: > { %s14_s19 = sadd.s32 1, %s1004_s19   ;;  %s1143_s15 = smov %s996_s17 }
  0xc2   : > { %p11_p9 = scmp.ge.s32.totalorder %s14_s19, 10   ;;  %s1144_s16 = smov %s1000_s18 }
  0xc3   : > { %s1145_s17 = smov %s1148_s20  ;;  %s1146_s18 = smov %s1152_s21 }
  0xc4   :  { %13 = sbr.rel (!%p11_p9) target bundleno = 3 (0x3), region = 78 }

</bundles_post_ra>
